<compile_context>
chip_gen: v6e
topology: v6e:2x2x1
jax: 0.10.0
libtpu: 0.0.40
codegen_flags: <defaults>
</compile_context>

<pallas_src>
import jax
import jax.numpy as jnp
from jax.experimental import pallas as pl
from jax.experimental.pallas import tpu as pltpu


_OUT_PAD = 128   # lane-dense width for the final store (true output width = 2)

_WEIGHT_ORDER = (
    "t1", "b1", "t2", "b2", "t3", "b3",
    "s1_w", "s1_b", "s2_w", "s2_b", "s3_w", "s3_b",
    "proj_w", "proj_b",
    "fc1_w", "fc1_b", "fc2_w", "fc2_b", "fc3_w", "fc3_b",
    "fc4_w", "fc4_b",
)


def _round_up(x, m):
    return ((x + m - 1) // m) * m


# --------------------------- the single fused kernel -------------------------

def _cost_predictor_kernel(
        img_ref, st_ref,
        t1, b1, t2, b2, t3, b3,
        s1w, s1b, s2w, s2b, s3w, s3b,
        pw, pb,
        f1w, f1b, f2w, f2b, f3w, f3b,
        f4w, f4b,
        out_ref):
    """Entire CostPredictor forward for one (TM, ...) row block of the batch."""

    def mm(x_f32, w_ref, b_ref):
        # bf16 operands feed the MXU; accumulate + bias stay f32.
        y = jnp.dot(x_f32.astype(jnp.bfloat16), w_ref[...],
                    preferred_element_type=jnp.float32)
        return y + b_ref[...]

    def leaky(v):                       # LeakyReLU(0.2), f32 on the VPU
        return jnp.where(v > 0, v, 0.2 * v)

    # f_encoder: three convs as Toeplitz matmuls on NHWC-flat features.
    h = leaky(mm(img_ref[...], t1, b1))
    h = leaky(mm(h, t2, b2))
    h = mm(h, t3, b3)                                   # (TM, hsize)

    # s_encoder MLP (last layer's columns pre-permuted to the NHWC order).
    s = leaky(mm(st_ref[...], s1w, s1b))
    s = leaky(mm(s, s2w, s2b))
    s = mm(s, s3w, s3b)                                 # (TM, hsize)

    # residual add fused into proj, then the fc head.
    h = mm(h + s, pw, pb)                               # (TM, n_hidden)
    h = jnp.maximum(mm(h, f1w, f1b), 0.0)
    h = jnp.maximum(mm(h, f2w, f2b), 0.0)
    h = jnp.maximum(mm(h, f3w, f3b), 0.0)
    out_ref[...] = jnp.tanh(mm(h, f4w, f4b))            # (TM, 128) lane-dense


# ------------------------------- wrapper --------------------------------------

def cost_predictor_forward(kparams, state_images, states, opt):
    B = state_images.shape[0]
    H, W = opt["height"], opt["width"]

    x = state_images.reshape(B, 3 * H * W).astype(jnp.float32)   # NCHW flatten
    s = states.reshape(B, -1).astype(jnp.float32)

    TM = min(128, _round_up(B, 8))          # row tile (multiple of 8 sublanes)
    Bp = _round_up(B, TM)
    if Bp != B:
        x = jnp.pad(x, ((0, Bp - B), (0, 0)))
        s = jnp.pad(s, ((0, Bp - B), (0, 0)))

    weights = [kparams[k] for k in _WEIGHT_ORDER]

    def row_spec(n):
        return pl.BlockSpec((TM, n), lambda i: (i, 0))

    def full_spec(a):                       # whole weight resident, same block
        return pl.BlockSpec(a.shape, lambda i: (0, 0))

    out = pl.pallas_call(
        _cost_predictor_kernel,
        out_shape=jax.ShapeDtypeStruct((Bp, _OUT_PAD), jnp.float32),
        grid_spec=pltpu.PrefetchScalarGridSpec(
            num_scalar_prefetch=0,
            grid=(Bp // TM,),
            in_specs=[row_spec(x.shape[1]), row_spec(s.shape[1])]
                     + [full_spec(a) for a in weights],
            out_specs=row_spec(_OUT_PAD),
        ),
        compiler_params=pltpu.CompilerParams(
            dimension_semantics=("parallel",)),
    )(x, s, *weights)

    return out[:B, :2]


# --------------------------- parameter preparation ----------------------------

def _conv_toeplitz(w, H, W, stride=2, pad=1, in_order="hwc"):
    """Exact dense Toeplitz matrix of a Conv2d(Cin, Cout, K, stride, pad).

    out_flat = in_flat @ T, with out_flat in NHWC order (y, x, c; c fastest)
    and in_flat in `in_order` ('hwc': c fastest, 'chw': x fastest == NCHW).
    """
    Cout, Cin, K, _ = w.shape
    Hout = (H + 2 * pad - K) // stride + 1
    Wout = (W + 2 * pad - K) // stride + 1
    yi = jnp.arange(H)[:, None, None]
    yo = jnp.arange(Hout)[None, :, None]
    kh = jnp.arange(K)[None, None, :]
    A = (yi == stride * yo + kh - pad).astype(jnp.float32)      # (H, Hout, K)
    xi = jnp.arange(W)[:, None, None]
    xo = jnp.arange(Wout)[None, :, None]
    kw = jnp.arange(K)[None, None, :]
    Bm = (xi == stride * xo + kw - pad).astype(jnp.float32)     # (W, Wout, K)
    # T[yi, xi, ci, yo, xo, co]; zero-padding handled by out-of-range drop.
    T = jnp.einsum("ypk,xql,oikl->yxipqo", A, Bm, w.astype(jnp.float32))
    if in_order == "chw":
        T = T.transpose(2, 0, 1, 3, 4, 5)                       # (ci, yi, xi, ...)
    return T.reshape(H * W * Cin, Hout * Wout * Cout), Hout, Wout


def prepare_kernel_params(p, opt):
    """Fold convs into Toeplitz matmuls, absorb layout permutations, cast MXU
    operands to bf16, pre-expand biases, pad the final layer to 128 lanes."""
    H, W = opt["height"], opt["width"]
    nh = opt["n_hidden"]
    kp = {}

    # convs -> Toeplitz matmuls.  conv1 consumes the raw NCHW image flatten.
    t1, H1, W1 = _conv_toeplitz(p["c1_w"], H, W, in_order="chw")
    t2, H2, W2 = _conv_toeplitz(p["c2_w"], H1, W1, in_order="hwc")
    t3, H3, W3 = _conv_toeplitz(p["c3_w"], H2, W2, in_order="hwc")
    assert H3 == opt["h_height"] and W3 == opt["h_width"]
    kp["t1"], kp["t2"], kp["t3"] = (t.astype(jnp.bfloat16) for t in (t1, t2, t3))
    kp["b1"] = jnp.tile(p["c1_b"], H1 * W1).reshape(1, -1).astype(jnp.float32)
    kp["b2"] = jnp.tile(p["c2_b"], H2 * W2).reshape(1, -1).astype(jnp.float32)
    kp["b3"] = jnp.tile(p["c3_b"], H3 * W3).reshape(1, -1).astype(jnp.float32)

    # NHWC-flat index f -> NCHW-flat index perm[f] of the final feature map.
    C3 = p["c3_w"].shape[0]
    Y, X, C = jnp.meshgrid(jnp.arange(H3), jnp.arange(W3), jnp.arange(C3),
                           indexing="ij")
    perm = (C * H3 * W3 + Y * W3 + X).reshape(-1)

    # s_encoder; last layer's output columns permuted into NHWC order so the
    # in-kernel residual add matches PyTorch's NCHW-flat add exactly.
    kp["s1_w"] = p["s1_w"].astype(jnp.bfloat16)
    kp["s1_b"] = p["s1_b"].reshape(1, -1).astype(jnp.float32)
    kp["s2_w"] = p["s2_w"].astype(jnp.bfloat16)
    kp["s2_b"] = p["s2_b"].reshape(1, -1).astype(jnp.float32)
    kp["s3_w"] = p["s3_w"][:, perm].astype(jnp.bfloat16)
    kp["s3_b"] = p["s3_b"][perm].reshape(1, -1).astype(jnp.float32)

    # proj absorbs the NCHW flatten by permuting its rows.
    kp["proj_w"] = p["proj_w"][perm, :].astype(jnp.bfloat16)
    kp["proj_b"] = p["proj_b"].reshape(1, -1).astype(jnp.float32)

    for name in ("fc1", "fc2", "fc3"):
        kp[name + "_w"] = p[name + "_w"].astype(jnp.bfloat16)
        kp[name + "_b"] = p[name + "_b"].reshape(1, -1).astype(jnp.float32)

    # Final layer zero-padded from 2 to 128 output lanes (lane-dense store).
    w4 = jnp.zeros((nh, _OUT_PAD), jnp.float32).at[:, :2].set(p["fc4_w"])
    b4 = jnp.zeros((1, _OUT_PAD), jnp.float32).at[:, :2].set(p["fc4_b"])
    kp["fc4_w"] = w4.astype(jnp.bfloat16)
    kp["fc4_b"] = b4
    return kp


# ------------------------------ parameter init --------------------------------

def _lin_init(key, fan_in, fan_out):
    kw, kb = jax.random.split(key)
    scale = 1.0 / jnp.sqrt(fan_in)
    w = jax.random.normal(kw, (fan_in, fan_out), jnp.float32) * scale
    b = jax.random.normal(kb, (fan_out,), jnp.float32) * 0.01
    return w, b


def _conv_init(key, cin, cout, k=4):
    kw, kb = jax.random.split(key)
    scale = 1.0 / jnp.sqrt(cin * k * k)
    w = jax.random.normal(kw, (cout, cin, k, k), jnp.float32) * scale
    b = jax.random.normal(kb, (cout,), jnp.float32) * 0.01
    return w, b


def init_params(key, opt):
    nf = opt["nfeature"]
    f0, f1, f2 = nf // 4, nf // 2, nf                    # opt.layers == 3
    nh = opt["n_hidden"]
    hsize = nf * opt["h_height"] * opt["h_width"]
    keys = jax.random.split(key, 12)
    p = {}
    p["c1_w"], p["c1_b"] = _conv_init(keys[0], 3, f0)
    p["c2_w"], p["c2_b"] = _conv_init(keys[1], f0, f1)
    p["c3_w"], p["c3_b"] = _conv_init(keys[2], f1, f2)
    p["s1_w"], p["s1_b"] = _lin_init(keys[3], 4, nf)
    p["s2_w"], p["s2_b"] = _lin_init(keys[4], nf, nf)
    p["s3_w"], p["s3_b"] = _lin_init(keys[5], nf, opt["hidden_size"])
    p["proj_w"], p["proj_b"] = _lin_init(keys[6], hsize, nh)
    p["fc1_w"], p["fc1_b"] = _lin_init(keys[7], nh, nh)
    p["fc2_w"], p["fc2_b"] = _lin_init(keys[8], nh, nh)
    p["fc3_w"], p["fc3_b"] = _lin_init(keys[9], nh, nh)
    p["fc4_w"], p["fc4_b"] = _lin_init(keys[10], nh, 2)
    return p


# ----------------------------- pure-JAX reference ------------------------------

def reference_forward(p, state_images, states, opt):
    def conv(x, w, b):
        y = jax.lax.conv_general_dilated(
            x, w, window_strides=(2, 2), padding=((1, 1), (1, 1)),
            dimension_numbers=("NCHW", "OIHW", "NCHW"))
        return y + b.reshape(1, -1, 1, 1)

    leaky = lambda v: jnp.where(v > 0, v, 0.2 * v)
    B = state_images.shape[0]
    x = state_images.reshape(B, 3, opt["height"], opt["width"])
    h = leaky(conv(x, p["c1_w"], p["c1_b"]))
    h = leaky(conv(h, p["c2_w"], p["c2_b"]))
    h = conv(h, p["c3_w"], p["c3_b"])
    s = states.reshape(B, -1)
    s = leaky(s @ p["s1_w"] + p["s1_b"])
    s = leaky(s @ p["s2_w"] + p["s2_b"])
    s = s @ p["s3_w"] + p["s3_b"]
    h = h.reshape(B, -1) + s
    h = h @ p["proj_w"] + p["proj_b"]
    h = jnp.maximum(h @ p["fc1_w"] + p["fc1_b"], 0.0)
    h = jnp.maximum(h @ p["fc2_w"] + p["fc2_b"], 0.0)
    h = jnp.maximum(h @ p["fc3_w"] + p["fc3_b"], 0.0)
    return jnp.tanh(h @ p["fc4_w"] + p["fc4_b"])


# ----------------------------------- main --------------------------------------

if __name__ == "__main__":
    # opt: layers=3, ncond=1, dropout=0 (identity at inference)
    opt = dict(nfeature=16, height=16, width=16, h_height=2, h_width=2,
               hidden_size=16 * 2 * 2, n_hidden=32)

    key = jax.random.PRNGKey(0)
    kkey, ki, ks = jax.random.split(key, 3)
    raw_params = init_params(kkey, opt)
    kparams = prepare_kernel_params(raw_params, opt)

    # batch=2, n_inputs=1 -> images (2, 3, 16, 16), states (2, 4)
    state_images = jax.random.normal(ki, (2, 3, 16, 16), jnp.float32)
    states = jax.random.normal(ks, (2, 4), jnp.float32)

    fwd = jax.jit(lambda kp, imgs, sts: cost_predictor_forward(kp, imgs, sts, opt))
    out = jax.block_until_ready(fwd(kparams, state_images, states))

    ref = reference_forward(raw_params, state_images, states, opt)
    assert out.shape == (2, 2)
    # tolerance relaxed vs. the pure-f32 version because MXU operands are bf16
    # (f32 accumulation), as recommended in the perf review.
    assert jnp.allclose(out, ref, rtol=5e-2, atol=5e-2), (out, ref)

    print("KERNEL_OK")
</pallas_src>

<mosaic_0001>
module attributes {stable_mosaic.version = 11 : i64} {
  func.func @_cost_predictor_kernel(%arg0: i32, %arg1: memref<8x768xf32, #tpu.memory_space<vmem>>, %arg2: memref<8x4xf32, #tpu.memory_space<vmem>>, %arg3: memref<768x256xbf16, #tpu.memory_space<vmem>>, %arg4: memref<1x256xf32, #tpu.memory_space<vmem>>, %arg5: memref<256x128xbf16, #tpu.memory_space<vmem>>, %arg6: memref<1x128xf32, #tpu.memory_space<vmem>>, %arg7: memref<128x64xbf16, #tpu.memory_space<vmem>>, %arg8: memref<1x64xf32, #tpu.memory_space<vmem>>, %arg9: memref<4x16xbf16, #tpu.memory_space<vmem>>, %arg10: memref<1x16xf32, #tpu.memory_space<vmem>>, %arg11: memref<16x16xbf16, #tpu.memory_space<vmem>>, %arg12: memref<1x16xf32, #tpu.memory_space<vmem>>, %arg13: memref<16x64xbf16, #tpu.memory_space<vmem>>, %arg14: memref<1x64xf32, #tpu.memory_space<vmem>>, %arg15: memref<64x32xbf16, #tpu.memory_space<vmem>>, %arg16: memref<1x32xf32, #tpu.memory_space<vmem>>, %arg17: memref<32x32xbf16, #tpu.memory_space<vmem>>, %arg18: memref<1x32xf32, #tpu.memory_space<vmem>>, %arg19: memref<32x32xbf16, #tpu.memory_space<vmem>>, %arg20: memref<1x32xf32, #tpu.memory_space<vmem>>, %arg21: memref<32x32xbf16, #tpu.memory_space<vmem>>, %arg22: memref<1x32xf32, #tpu.memory_space<vmem>>, %arg23: memref<32x128xbf16, #tpu.memory_space<vmem>>, %arg24: memref<1x128xf32, #tpu.memory_space<vmem>>, %arg25: memref<8x128xf32, #tpu.memory_space<vmem>>) attributes {dimension_semantics = [#tpu.dimension_semantics<parallel>], iteration_bounds = array<i64: 1>, scalar_prefetch = 0 : i64, scratch_operands = 0 : i64, tpu.core_type = #tpu.core_type<tc>, window_params = [{transform_indices = @transform_0, window_bounds = array<i64: 8, 768>}, {transform_indices = @transform_1, window_bounds = array<i64: 8, 4>}, {pipeline_mode = #tpu.pipeline_mode<synchronous>, transform_indices = @transform_2, window_bounds = array<i64: 768, 256>}, {pipeline_mode = #tpu.pipeline_mode<synchronous>, transform_indices = @transform_3, window_bounds = array<i64: 1, 256>}, {pipeline_mode = #tpu.pipeline_mode<synchronous>, transform_indices = @transform_4, window_bounds = array<i64: 256, 128>}, {pipeline_mode = #tpu.pipeline_mode<synchronous>, transform_indices = @transform_5, window_bounds = array<i64: 1, 128>}, {pipeline_mode = #tpu.pipeline_mode<synchronous>, transform_indices = @transform_6, window_bounds = array<i64: 128, 64>}, {pipeline_mode = #tpu.pipeline_mode<synchronous>, transform_indices = @transform_7, window_bounds = array<i64: 1, 64>}, {pipeline_mode = #tpu.pipeline_mode<synchronous>, transform_indices = @transform_8, window_bounds = array<i64: 4, 16>}, {pipeline_mode = #tpu.pipeline_mode<synchronous>, transform_indices = @transform_9, window_bounds = array<i64: 1, 16>}, {pipeline_mode = #tpu.pipeline_mode<synchronous>, transform_indices = @transform_10, window_bounds = array<i64: 16, 16>}, {pipeline_mode = #tpu.pipeline_mode<synchronous>, transform_indices = @transform_11, window_bounds = array<i64: 1, 16>}, {pipeline_mode = #tpu.pipeline_mode<synchronous>, transform_indices = @transform_12, window_bounds = array<i64: 16, 64>}, {pipeline_mode = #tpu.pipeline_mode<synchronous>, transform_indices = @transform_13, window_bounds = array<i64: 1, 64>}, {pipeline_mode = #tpu.pipeline_mode<synchronous>, transform_indices = @transform_14, window_bounds = array<i64: 64, 32>}, {pipeline_mode = #tpu.pipeline_mode<synchronous>, transform_indices = @transform_15, window_bounds = array<i64: 1, 32>}, {pipeline_mode = #tpu.pipeline_mode<synchronous>, transform_indices = @transform_16, window_bounds = array<i64: 32, 32>}, {pipeline_mode = #tpu.pipeline_mode<synchronous>, transform_indices = @transform_17, window_bounds = array<i64: 1, 32>}, {pipeline_mode = #tpu.pipeline_mode<synchronous>, transform_indices = @transform_18, window_bounds = array<i64: 32, 32>}, {pipeline_mode = #tpu.pipeline_mode<synchronous>, transform_indices = @transform_19, window_bounds = array<i64: 1, 32>}, {pipeline_mode = #tpu.pipeline_mode<synchronous>, transform_indices = @transform_20, window_bounds = array<i64: 32, 32>}, {pipeline_mode = #tpu.pipeline_mode<synchronous>, transform_indices = @transform_21, window_bounds = array<i64: 1, 32>}, {pipeline_mode = #tpu.pipeline_mode<synchronous>, transform_indices = @transform_22, window_bounds = array<i64: 32, 128>}, {pipeline_mode = #tpu.pipeline_mode<synchronous>, transform_indices = @transform_23, window_bounds = array<i64: 1, 128>}, {transform_indices = @transform_24, window_bounds = array<i64: 8, 128>}]} {
    %c0 = arith.constant 0 : index
    %c0_0 = arith.constant 0 : index
    %0 = vector.load %arg1[%c0, %c0_0] : memref<8x768xf32, #tpu.memory_space<vmem>>, vector<8x768xf32>
    %1 = arith.truncf %0 : vector<8x768xf32> to vector<8x768xbf16>
    %c0_1 = arith.constant 0 : index
    %c0_2 = arith.constant 0 : index
    %2 = vector.load %arg3[%c0_1, %c0_2] : memref<768x256xbf16, #tpu.memory_space<vmem>>, vector<768x256xbf16>
    %cst = arith.constant dense<0.000000e+00> : vector<8x256xf32>
    %3 = tpu.matmul %1, %2, %cst {dimension_numbers = #tpu.dot_dimension_numbers<[1], [0], [0], [1], [0, 0, 1, 1], [], []>} : vector<8x768xbf16>, vector<768x256xbf16>, vector<8x256xf32> -> vector<8x256xf32>
    %c0_3 = arith.constant 0 : index
    %c0_4 = arith.constant 0 : index
    %4 = vector.load %arg4[%c0_3, %c0_4] : memref<1x256xf32, #tpu.memory_space<vmem>>, vector<1x256xf32>
    %5 = vector.broadcast %4 : vector<1x256xf32> to vector<8x256xf32>
    %6 = arith.addf %3, %5 : vector<8x256xf32>
    %cst_5 = arith.constant 0.000000e+00 : f32
    %7 = vector.broadcast %cst_5 : f32 to vector<8x256xf32>
    %8 = arith.cmpf ogt, %6, %7 : vector<8x256xf32>
    %cst_6 = arith.constant 2.000000e-01 : f32
    %9 = vector.broadcast %cst_6 : f32 to vector<8x256xf32>
    %10 = arith.mulf %9, %6 : vector<8x256xf32>
    %11 = arith.select %8, %6, %10 : vector<8x256xi1>, vector<8x256xf32>
    %12 = arith.truncf %11 : vector<8x256xf32> to vector<8x256xbf16>
    %c0_7 = arith.constant 0 : index
    %c0_8 = arith.constant 0 : index
    %13 = vector.load %arg5[%c0_7, %c0_8] : memref<256x128xbf16, #tpu.memory_space<vmem>>, vector<256x128xbf16>
    %cst_9 = arith.constant dense<0.000000e+00> : vector<8x128xf32>
    %14 = tpu.matmul %12, %13, %cst_9 {dimension_numbers = #tpu.dot_dimension_numbers<[1], [0], [0], [1], [0, 0, 1, 1], [], []>} : vector<8x256xbf16>, vector<256x128xbf16>, vector<8x128xf32> -> vector<8x128xf32>
    %c0_10 = arith.constant 0 : index
    %c0_11 = arith.constant 0 : index
    %15 = vector.load %arg6[%c0_10, %c0_11] : memref<1x128xf32, #tpu.memory_space<vmem>>, vector<1x128xf32>
    %16 = vector.broadcast %15 : vector<1x128xf32> to vector<8x128xf32>
    %17 = arith.addf %14, %16 : vector<8x128xf32>
    %cst_12 = arith.constant 0.000000e+00 : f32
    %18 = vector.broadcast %cst_12 : f32 to vector<8x128xf32>
    %19 = arith.cmpf ogt, %17, %18 : vector<8x128xf32>
    %cst_13 = arith.constant 2.000000e-01 : f32
    %20 = vector.broadcast %cst_13 : f32 to vector<8x128xf32>
    %21 = arith.mulf %20, %17 : vector<8x128xf32>
    %22 = arith.select %19, %17, %21 : vector<8x128xi1>, vector<8x128xf32>
    %23 = arith.truncf %22 : vector<8x128xf32> to vector<8x128xbf16>
    %c0_14 = arith.constant 0 : index
    %c0_15 = arith.constant 0 : index
    %24 = vector.load %arg7[%c0_14, %c0_15] : memref<128x64xbf16, #tpu.memory_space<vmem>>, vector<128x64xbf16>
    %cst_16 = arith.constant dense<0.000000e+00> : vector<8x64xf32>
    %25 = tpu.matmul %23, %24, %cst_16 {dimension_numbers = #tpu.dot_dimension_numbers<[1], [0], [0], [1], [0, 0, 1, 1], [], []>} : vector<8x128xbf16>, vector<128x64xbf16>, vector<8x64xf32> -> vector<8x64xf32>
    %c0_17 = arith.constant 0 : index
    %c0_18 = arith.constant 0 : index
    %26 = vector.load %arg8[%c0_17, %c0_18] : memref<1x64xf32, #tpu.memory_space<vmem>>, vector<1x64xf32>
    %27 = vector.broadcast %26 : vector<1x64xf32> to vector<8x64xf32>
    %28 = arith.addf %25, %27 : vector<8x64xf32>
    %c0_19 = arith.constant 0 : index
    %c0_20 = arith.constant 0 : index
    %29 = vector.load %arg2[%c0_19, %c0_20] : memref<8x4xf32, #tpu.memory_space<vmem>>, vector<8x4xf32>
    %30 = arith.truncf %29 : vector<8x4xf32> to vector<8x4xbf16>
    %c0_21 = arith.constant 0 : index
    %c0_22 = arith.constant 0 : index
    %31 = vector.load %arg9[%c0_21, %c0_22] : memref<4x16xbf16, #tpu.memory_space<vmem>>, vector<4x16xbf16>
    %cst_23 = arith.constant dense<0.000000e+00> : vector<8x16xf32>
    %32 = tpu.matmul %30, %31, %cst_23 {dimension_numbers = #tpu.dot_dimension_numbers<[1], [0], [0], [1], [0, 0, 1, 1], [], []>} : vector<8x4xbf16>, vector<4x16xbf16>, vector<8x16xf32> -> vector<8x16xf32>
    %c0_24 = arith.constant 0 : index
    %c0_25 = arith.constant 0 : index
    %33 = vector.load %arg10[%c0_24, %c0_25] : memref<1x16xf32, #tpu.memory_space<vmem>>, vector<1x16xf32>
    %34 = vector.broadcast %33 : vector<1x16xf32> to vector<8x16xf32>
    %35 = arith.addf %32, %34 : vector<8x16xf32>
    %cst_26 = arith.constant 0.000000e+00 : f32
    %36 = vector.broadcast %cst_26 : f32 to vector<8x16xf32>
    %37 = arith.cmpf ogt, %35, %36 : vector<8x16xf32>
    %cst_27 = arith.constant 2.000000e-01 : f32
    %38 = vector.broadcast %cst_27 : f32 to vector<8x16xf32>
    %39 = arith.mulf %38, %35 : vector<8x16xf32>
    %40 = arith.select %37, %35, %39 : vector<8x16xi1>, vector<8x16xf32>
    %41 = arith.truncf %40 : vector<8x16xf32> to vector<8x16xbf16>
    %c0_28 = arith.constant 0 : index
    %c0_29 = arith.constant 0 : index
    %42 = vector.load %arg11[%c0_28, %c0_29] : memref<16x16xbf16, #tpu.memory_space<vmem>>, vector<16x16xbf16>
    %cst_30 = arith.constant dense<0.000000e+00> : vector<8x16xf32>
    %43 = tpu.matmul %41, %42, %cst_30 {dimension_numbers = #tpu.dot_dimension_numbers<[1], [0], [0], [1], [0, 0, 1, 1], [], []>} : vector<8x16xbf16>, vector<16x16xbf16>, vector<8x16xf32> -> vector<8x16xf32>
    %c0_31 = arith.constant 0 : index
    %c0_32 = arith.constant 0 : index
    %44 = vector.load %arg12[%c0_31, %c0_32] : memref<1x16xf32, #tpu.memory_space<vmem>>, vector<1x16xf32>
    %45 = vector.broadcast %44 : vector<1x16xf32> to vector<8x16xf32>
    %46 = arith.addf %43, %45 : vector<8x16xf32>
    %cst_33 = arith.constant 0.000000e+00 : f32
    %47 = vector.broadcast %cst_33 : f32 to vector<8x16xf32>
    %48 = arith.cmpf ogt, %46, %47 : vector<8x16xf32>
    %cst_34 = arith.constant 2.000000e-01 : f32
    %49 = vector.broadcast %cst_34 : f32 to vector<8x16xf32>
    %50 = arith.mulf %49, %46 : vector<8x16xf32>
    %51 = arith.select %48, %46, %50 : vector<8x16xi1>, vector<8x16xf32>
    %52 = arith.truncf %51 : vector<8x16xf32> to vector<8x16xbf16>
    %c0_35 = arith.constant 0 : index
    %c0_36 = arith.constant 0 : index
    %53 = vector.load %arg13[%c0_35, %c0_36] : memref<16x64xbf16, #tpu.memory_space<vmem>>, vector<16x64xbf16>
    %cst_37 = arith.constant dense<0.000000e+00> : vector<8x64xf32>
    %54 = tpu.matmul %52, %53, %cst_37 {dimension_numbers = #tpu.dot_dimension_numbers<[1], [0], [0], [1], [0, 0, 1, 1], [], []>} : vector<8x16xbf16>, vector<16x64xbf16>, vector<8x64xf32> -> vector<8x64xf32>
    %c0_38 = arith.constant 0 : index
    %c0_39 = arith.constant 0 : index
    %55 = vector.load %arg14[%c0_38, %c0_39] : memref<1x64xf32, #tpu.memory_space<vmem>>, vector<1x64xf32>
    %56 = vector.broadcast %55 : vector<1x64xf32> to vector<8x64xf32>
    %57 = arith.addf %54, %56 : vector<8x64xf32>
    %58 = arith.addf %28, %57 : vector<8x64xf32>
    %59 = arith.truncf %58 : vector<8x64xf32> to vector<8x64xbf16>
    %c0_40 = arith.constant 0 : index
    %c0_41 = arith.constant 0 : index
    %60 = vector.load %arg15[%c0_40, %c0_41] : memref<64x32xbf16, #tpu.memory_space<vmem>>, vector<64x32xbf16>
    %cst_42 = arith.constant dense<0.000000e+00> : vector<8x32xf32>
    %61 = tpu.matmul %59, %60, %cst_42 {dimension_numbers = #tpu.dot_dimension_numbers<[1], [0], [0], [1], [0, 0, 1, 1], [], []>} : vector<8x64xbf16>, vector<64x32xbf16>, vector<8x32xf32> -> vector<8x32xf32>
    %c0_43 = arith.constant 0 : index
    %c0_44 = arith.constant 0 : index
    %62 = vector.load %arg16[%c0_43, %c0_44] : memref<1x32xf32, #tpu.memory_space<vmem>>, vector<1x32xf32>
    %63 = vector.broadcast %62 : vector<1x32xf32> to vector<8x32xf32>
    %64 = arith.addf %61, %63 : vector<8x32xf32>
    %65 = arith.truncf %64 : vector<8x32xf32> to vector<8x32xbf16>
    %c0_45 = arith.constant 0 : index
    %c0_46 = arith.constant 0 : index
    %66 = vector.load %arg17[%c0_45, %c0_46] : memref<32x32xbf16, #tpu.memory_space<vmem>>, vector<32x32xbf16>
    %cst_47 = arith.constant dense<0.000000e+00> : vector<8x32xf32>
    %67 = tpu.matmul %65, %66, %cst_47 {dimension_numbers = #tpu.dot_dimension_numbers<[1], [0], [0], [1], [0, 0, 1, 1], [], []>} : vector<8x32xbf16>, vector<32x32xbf16>, vector<8x32xf32> -> vector<8x32xf32>
    %c0_48 = arith.constant 0 : index
    %c0_49 = arith.constant 0 : index
    %68 = vector.load %arg18[%c0_48, %c0_49] : memref<1x32xf32, #tpu.memory_space<vmem>>, vector<1x32xf32>
    %69 = vector.broadcast %68 : vector<1x32xf32> to vector<8x32xf32>
    %70 = arith.addf %67, %69 : vector<8x32xf32>
    %cst_50 = arith.constant 0.000000e+00 : f32
    %71 = vector.broadcast %cst_50 : f32 to vector<8x32xf32>
    %72 = arith.maximumf %70, %71 : vector<8x32xf32>
    %73 = arith.truncf %72 : vector<8x32xf32> to vector<8x32xbf16>
    %c0_51 = arith.constant 0 : index
    %c0_52 = arith.constant 0 : index
    %74 = vector.load %arg19[%c0_51, %c0_52] : memref<32x32xbf16, #tpu.memory_space<vmem>>, vector<32x32xbf16>
    %cst_53 = arith.constant dense<0.000000e+00> : vector<8x32xf32>
    %75 = tpu.matmul %73, %74, %cst_53 {dimension_numbers = #tpu.dot_dimension_numbers<[1], [0], [0], [1], [0, 0, 1, 1], [], []>} : vector<8x32xbf16>, vector<32x32xbf16>, vector<8x32xf32> -> vector<8x32xf32>
    %c0_54 = arith.constant 0 : index
    %c0_55 = arith.constant 0 : index
    %76 = vector.load %arg20[%c0_54, %c0_55] : memref<1x32xf32, #tpu.memory_space<vmem>>, vector<1x32xf32>
    %77 = vector.broadcast %76 : vector<1x32xf32> to vector<8x32xf32>
    %78 = arith.addf %75, %77 : vector<8x32xf32>
    %cst_56 = arith.constant 0.000000e+00 : f32
    %79 = vector.broadcast %cst_56 : f32 to vector<8x32xf32>
    %80 = arith.maximumf %78, %79 : vector<8x32xf32>
    %81 = arith.truncf %80 : vector<8x32xf32> to vector<8x32xbf16>
    %c0_57 = arith.constant 0 : index
    %c0_58 = arith.constant 0 : index
    %82 = vector.load %arg21[%c0_57, %c0_58] : memref<32x32xbf16, #tpu.memory_space<vmem>>, vector<32x32xbf16>
    %cst_59 = arith.constant dense<0.000000e+00> : vector<8x32xf32>
    %83 = tpu.matmul %81, %82, %cst_59 {dimension_numbers = #tpu.dot_dimension_numbers<[1], [0], [0], [1], [0, 0, 1, 1], [], []>} : vector<8x32xbf16>, vector<32x32xbf16>, vector<8x32xf32> -> vector<8x32xf32>
    %c0_60 = arith.constant 0 : index
    %c0_61 = arith.constant 0 : index
    %84 = vector.load %arg22[%c0_60, %c0_61] : memref<1x32xf32, #tpu.memory_space<vmem>>, vector<1x32xf32>
    %85 = vector.broadcast %84 : vector<1x32xf32> to vector<8x32xf32>
    %86 = arith.addf %83, %85 : vector<8x32xf32>
    %cst_62 = arith.constant 0.000000e+00 : f32
    %87 = vector.broadcast %cst_62 : f32 to vector<8x32xf32>
    %88 = arith.maximumf %86, %87 : vector<8x32xf32>
    %89 = arith.truncf %88 : vector<8x32xf32> to vector<8x32xbf16>
    %c0_63 = arith.constant 0 : index
    %c0_64 = arith.constant 0 : index
    %90 = vector.load %arg23[%c0_63, %c0_64] : memref<32x128xbf16, #tpu.memory_space<vmem>>, vector<32x128xbf16>
    %cst_65 = arith.constant dense<0.000000e+00> : vector<8x128xf32>
    %91 = tpu.matmul %89, %90, %cst_65 {dimension_numbers = #tpu.dot_dimension_numbers<[1], [0], [0], [1], [0, 0, 1, 1], [], []>} : vector<8x32xbf16>, vector<32x128xbf16>, vector<8x128xf32> -> vector<8x128xf32>
    %c0_66 = arith.constant 0 : index
    %c0_67 = arith.constant 0 : index
    %92 = vector.load %arg24[%c0_66, %c0_67] : memref<1x128xf32, #tpu.memory_space<vmem>>, vector<1x128xf32>
    %93 = vector.broadcast %92 : vector<1x128xf32> to vector<8x128xf32>
    %94 = arith.addf %91, %93 : vector<8x128xf32>
    %95 = math.tanh %94 : vector<8x128xf32>
    %c0_68 = arith.constant 0 : index
    %c0_69 = arith.constant 0 : index
    %96 = vector.load %arg25[%c0_68, %c0_69] : memref<8x128xf32, #tpu.memory_space<vmem>>, vector<8x128xf32>
    tpu.vector_store %arg25[%c0_68, %c0_69], %95 {strides = array<i32>} : memref<8x128xf32, #tpu.memory_space<vmem>>, vector<8x128xf32>,
    return
  }
  func.func @transform_0(%arg0: i32) -> (i32, i32) {
    %c0_i32 = arith.constant 0 : i32
    %c0_i32_0 = arith.constant 0 : i32
    return %arg0, %c0_i32 : i32, i32
  }
  func.func @transform_1(%arg0: i32) -> (i32, i32) {
    %c0_i32 = arith.constant 0 : i32
    %c0_i32_0 = arith.constant 0 : i32
    return %arg0, %c0_i32 : i32, i32
  }
  func.func @transform_2(%arg0: i32) -> (i32, i32) {
    %c0_i32 = arith.constant 0 : i32
    %c0_i32_0 = arith.constant 0 : i32
    %c0_i32_1 = arith.constant 0 : i32
    return %c0_i32, %c0_i32_0 : i32, i32
  }
  func.func @transform_3(%arg0: i32) -> (i32, i32) {
    %c0_i32 = arith.constant 0 : i32
    %c0_i32_0 = arith.constant 0 : i32
    %c0_i32_1 = arith.constant 0 : i32
    return %c0_i32, %c0_i32_0 : i32, i32
  }
  func.func @transform_4(%arg0: i32) -> (i32, i32) {
    %c0_i32 = arith.constant 0 : i32
    %c0_i32_0 = arith.constant 0 : i32
    %c0_i32_1 = arith.constant 0 : i32
    return %c0_i32, %c0_i32_0 : i32, i32
  }
  func.func @transform_5(%arg0: i32) -> (i32, i32) {
    %c0_i32 = arith.constant 0 : i32
    %c0_i32_0 = arith.constant 0 : i32
    %c0_i32_1 = arith.constant 0 : i32
    return %c0_i32, %c0_i32_0 : i32, i32
  }
  func.func @transform_6(%arg0: i32) -> (i32, i32) {
    %c0_i32 = arith.constant 0 : i32
    %c0_i32_0 = arith.constant 0 : i32
    %c0_i32_1 = arith.constant 0 : i32
    return %c0_i32, %c0_i32_0 : i32, i32
  }
  func.func @transform_7(%arg0: i32) -> (i32, i32) {
    %c0_i32 = arith.constant 0 : i32
    %c0_i32_0 = arith.constant 0 : i32
    %c0_i32_1 = arith.constant 0 : i32
    return %c0_i32, %c0_i32_0 : i32, i32
  }
  func.func @transform_8(%arg0: i32) -> (i32, i32) {
    %c0_i32 = arith.constant 0 : i32
    %c0_i32_0 = arith.constant 0 : i32
    %c0_i32_1 = arith.constant 0 : i32
    return %c0_i32, %c0_i32_0 : i32, i32
  }
  func.func @transform_9(%arg0: i32) -> (i32, i32) {
    %c0_i32 = arith.constant 0 : i32
    %c0_i32_0 = arith.constant 0 : i32
    %c0_i32_1 = arith.constant 0 : i32
    return %c0_i32, %c0_i32_0 : i32, i32
  }
  func.func @transform_10(%arg0: i32) -> (i32, i32) {
    %c0_i32 = arith.constant 0 : i32
    %c0_i32_0 = arith.constant 0 : i32
    %c0_i32_1 = arith.constant 0 : i32
    return %c0_i32, %c0_i32_0 : i32, i32
  }
  func.func @transform_11(%arg0: i32) -> (i32, i32) {
    %c0_i32 = arith.constant 0 : i32
    %c0_i32_0 = arith.constant 0 : i32
    %c0_i32_1 = arith.constant 0 : i32
    return %c0_i32, %c0_i32_0 : i32, i32
  }
  func.func @transform_12(%arg0: i32) -> (i32, i32) {
    %c0_i32 = arith.constant 0 : i32
    %c0_i32_0 = arith.constant 0 : i32
    %c0_i32_1 = arith.constant 0 : i32
    return %c0_i32, %c0_i32_0 : i32, i32
  }
  func.func @transform_13(%arg0: i32) -> (i32, i32) {
    %c0_i32 = arith.constant 0 : i32
    %c0_i32_0 = arith.constant 0 : i32
    %c0_i32_1 = arith.constant 0 : i32
    return %c0_i32, %c0_i32_0 : i32, i32
  }
  func.func @transform_14(%arg0: i32) -> (i32, i32) {
    %c0_i32 = arith.constant 0 : i32
    %c0_i32_0 = arith.constant 0 : i32
    %c0_i32_1 = arith.constant 0 : i32
    return %c0_i32, %c0_i32_0 : i32, i32
  }
  func.func @transform_15(%arg0: i32) -> (i32, i32) {
    %c0_i32 = arith.constant 0 : i32
    %c0_i32_0 = arith.constant 0 : i32
    %c0_i32_1 = arith.constant 0 : i32
    return %c0_i32, %c0_i32_0 : i32, i32
  }
  func.func @transform_16(%arg0: i32) -> (i32, i32) {
    %c0_i32 = arith.constant 0 : i32
    %c0_i32_0 = arith.constant 0 : i32
    %c0_i32_1 = arith.constant 0 : i32
    return %c0_i32, %c0_i32_0 : i32, i32
  }
  func.func @transform_17(%arg0: i32) -> (i32, i32) {
    %c0_i32 = arith.constant 0 : i32
    %c0_i32_0 = arith.constant 0 : i32
    %c0_i32_1 = arith.constant 0 : i32
    return %c0_i32, %c0_i32_0 : i32, i32
  }
  func.func @transform_18(%arg0: i32) -> (i32, i32) {
    %c0_i32 = arith.constant 0 : i32
    %c0_i32_0 = arith.constant 0 : i32
    %c0_i32_1 = arith.constant 0 : i32
    return %c0_i32, %c0_i32_0 : i32, i32
  }
  func.func @transform_19(%arg0: i32) -> (i32, i32) {
    %c0_i32 = arith.constant 0 : i32
    %c0_i32_0 = arith.constant 0 : i32
    %c0_i32_1 = arith.constant 0 : i32
    return %c0_i32, %c0_i32_0 : i32, i32
  }
  func.func @transform_20(%arg0: i32) -> (i32, i32) {
    %c0_i32 = arith.constant 0 : i32
    %c0_i32_0 = arith.constant 0 : i32
    %c0_i32_1 = arith.constant 0 : i32
    return %c0_i32, %c0_i32_0 : i32, i32
  }
  func.func @transform_21(%arg0: i32) -> (i32, i32) {
    %c0_i32 = arith.constant 0 : i32
    %c0_i32_0 = arith.constant 0 : i32
    %c0_i32_1 = arith.constant 0 : i32
    return %c0_i32, %c0_i32_0 : i32, i32
  }
  func.func @transform_22(%arg0: i32) -> (i32, i32) {
    %c0_i32 = arith.constant 0 : i32
    %c0_i32_0 = arith.constant 0 : i32
    %c0_i32_1 = arith.constant 0 : i32
    return %c0_i32, %c0_i32_0 : i32, i32
  }
  func.func @transform_23(%arg0: i32) -> (i32, i32) {
    %c0_i32 = arith.constant 0 : i32
    %c0_i32_0 = arith.constant 0 : i32
    %c0_i32_1 = arith.constant 0 : i32
    return %c0_i32, %c0_i32_0 : i32, i32
  }
  func.func @transform_24(%arg0: i32) -> (i32, i32) {
    %c0_i32 = arith.constant 0 : i32
    %c0_i32_0 = arith.constant 0 : i32
    return %arg0, %c0_i32 : i32, i32
  }
}

</mosaic_0001>

<bundles_post_ra>
// kernel: _lambda_.1
= control target key start
LH: loop header
LB: loop body
LE: loop exit
PB: predicated region body
PF: predicated region fallthrough
CT: control target
= control target key end

     0   :  { %s2513_s0 = inlined_call_operand.vmem [shape: f32[8,768], index: 0, kind: input, shape index: {}]   ;;  %s2514_s1 = inlined_call_operand.vmem [shape: f32[8,4], index: 1, kind: input, shape index: {}]   ;;  %s2515_s2 = inlined_call_operand.hbm [shape: bf16[768,256], index: 2, kind: input, shape index: {}]   ;;  %s2516_s3 = inlined_call_operand.vmem [shape: f32[1,256], index: 3, kind: input, shape index: {}]   ;;  %s2517_s4 = inlined_call_operand.vmem [shape: bf16[256,128], index: 4, kind: input, shape index: {}]   ;;  %s2518_s5 = inlined_call_operand.vmem [shape: f32[1,128], index: 5, kind: input, shape index: {}]   ;;  %s2519_s6 = inlined_call_operand.vmem [shape: bf16[128,64], index: 6, kind: input, shape index: {}]   ;;  %s2520_s7 = inlined_call_operand.vmem [shape: f32[1,64], index: 7, kind: input, shape index: {}]   ;;  %s2521_s8 = inlined_call_operand.vmem [shape: bf16[4,16], index: 8, kind: input, shape index: {}]   ;;  %s2522_s9 = inlined_call_operand.vmem [shape: f32[1,16], index: 9, kind: input, shape index: {}]   ;;  %s2523_s10 = inlined_call_operand.vmem [shape: bf16[16,16], index: 10, kind: input, shape index: {}]   ;;  %s2524_s11 = inlined_call_operand.vmem [shape: f32[1,16], index: 11, kind: input, shape index: {}]   ;;  %s2525_s12 = inlined_call_operand.vmem [shape: bf16[16,64], index: 12, kind: input, shape index: {}]   ;;  %s2526_s13 = inlined_call_operand.vmem [shape: f32[1,64], index: 13, kind: input, shape index: {}]   ;;  %s2527_s14 = inlined_call_operand.vmem [shape: bf16[64,32], index: 14, kind: input, shape index: {}]   ;;  %s2528_s15 = inlined_call_operand.vmem [shape: f32[1,32], index: 15, kind: input, shape index: {}]   ;;  %s2529_s16 = inlined_call_operand.vmem [shape: bf16[32,32], index: 16, kind: input, shape index: {}]   ;;  %s2530_s17 = inlined_call_operand.vmem [shape: f32[1,32], index: 17, kind: input, shape index: {}]   ;;  %s2531_s18 = inlined_call_operand.vmem [shape: bf16[32,32], index: 18, kind: input, shape index: {}]   ;;  %s2532_s19 = inlined_call_operand.vmem [shape: f32[1,32], index: 19, kind: input, shape index: {}]   ;;  %s2533_s20 = inlined_call_operand.vmem [shape: bf16[32,32], index: 20, kind: input, shape index: {}]   ;;  %s2534_s21 = inlined_call_operand.vmem [shape: f32[1,32], index: 21, kind: input, shape index: {}]   ;;  %s2535_s22 = inlined_call_operand.vmem [shape: bf16[32,128], index: 22, kind: input, shape index: {}]   ;;  %s2536_s23 = inlined_call_operand.vmem [shape: f32[1,128], index: 23, kind: input, shape index: {}]   ;;  %s2537_s24 = inlined_call_operand.vmem [shape: f32[8,128], index: 24, kind: output, shape index: {}]  }
   0x1   :  { %2541 = sst [smem:[#allocation5_spill]] %s2513_s0 }
   0x2   :  { %2542 = sst [smem:[#allocation6_spill]] %s2514_s1 }
   0x3   :  { %2543 = sst [smem:[#allocation7_spill]] %s2515_s2 }
   0x4   :  { %2544 = sst [smem:[#allocation8_spill]] %s2516_s3 }
   0x5   :  { %2545 = sst [smem:[#allocation9_spill]] %s2517_s4 }
   0x6   :  { %2546 = sst [smem:[#allocation10_spill]] %s2518_s5 }
   0x7   :  { %2547 = sst [smem:[#allocation11_spill]] %s2519_s6 }
   0x8   :  { %2548 = sst [smem:[#allocation12_spill]] %s2520_s7 }
   0x9   :  { %2549 = sst [smem:[#allocation13_spill]] %s2521_s8 }
   0xa   :  { %29 = vsyncpa [#allocation3], 0  ;;  %s2159_s5 = smov [#allocation2]  }
   0xb   :  { %s39_s26 = sshll.u32 %s2159_s5, 4  ;;  %s40_s26 = int_to_ptr.vmem [resolvable:$true] %s39_s26 }
   0xc   :  { %s2145_s27 = scalar_lea.vmem %s40_s26, 12288  ;;  %p2150_p1 = scmp.lt.s32.totalorder %s40_s26, %s40_s26 }
   0xd   :  { %p2146_p0 = scmp.ne.s32.totalorder %s40_s26, %s2145_s27  ;;  %p2151_p2 = scmp.lt.s32.totalorder %s2145_s27, %s2145_s27 }
   0xf   :  { %p2152_p3 = por %p2151_p2, %p2150_p1 }
  0x11   :  { %p2153_p4 = pnand %p2152_p3, %p2146_p0 }
  0x13   :  { %2156 = shalt.err (!%p2153_p4)
}
  0x14   :  { %s2160_s28 = smov 128   ;;  %s2161_s6 = smov 8  }
  0x15   :  { %s2550_s0 = sld [smem:[#allocation7_spill]] }
  0x1b   :  { %45 = dma.hbm_to_vmem [thread:$0]  %s2550_s0, 12288, %s40_s26, [#allocation3], %s2160_s28, %s2160_s28, %s2161_s6  }
  0x1c   :  { %2157 = dma.done.wait [#allocation3], 12288  }
  0x1d   :  { %2158 = vsyncadd [#allocation3], 4294955008  ;;  %v1953_v0 = vld [vmem:[#allocation2 + $0x74] ss:$8 sps:$4 sm:$0xff]   ;;  %v1955_v1 = vld [vmem:[#allocation2 + $0x70] ss:$8 sps:$4 sm:$0xff]  }
  0x1e   :  { %692 = vmatprep.subr.bf16.mxu0 %v1953_v0  ;;  %v1956_v2 = vld [vmem:[#allocation2 + $0x174] ss:$8 sps:$4 sm:$0xff]   ;;  %v1958_v3 = vld [vmem:[#allocation2 + $0x170] ss:$8 sps:$4 sm:$0xff]   ;;  %v1959_v4 = vld [vmem:[#allocation2 + $0x64] ss:$8 sps:$4 sm:$0xff]  }
  0x1f   :  { %693 = vmatpush1.bf16.msra.mxu0 %v1955_v1  ;;  %v1961_v5 = vld [vmem:[#allocation2 + $0x60] ss:$8 sps:$4 sm:$0xff]   ;;  %733 = vmatprep.subr.bf16.mxu1 %v1956_v2  ;;  %v1962_v6 = vld [vmem:[#allocation2 + $0x164] ss:$8 sps:$4 sm:$0xff]   ;;  %v1965_v8 = vld [vmem:[#allocation2 + $0x54] ss:$8 sps:$4 sm:$0xff]  }
  0x20   :  { %734 = vmatpush1.bf16.msra.mxu1 %v1958_v3  ;;  %694 = vmatprep.subr.bf16.mxu0 %v1959_v4  ;;  %v1964_v7 = vld [vmem:[#allocation2 + $0x160] ss:$8 sps:$4 sm:$0xff]   ;;  %v1967_v9 = vld [vmem:[#allocation2 + $0x50] ss:$8 sps:$4 sm:$0xff]   ;;  %v1968_v10 = vld [vmem:[#allocation2 + $0x154] ss:$8 sps:$4 sm:$0xff]  }
  0x21   :  { %735 = vmatprep.subr.bf16.mxu1 %v1962_v6  ;;  %v1971_v11 = vld [vmem:[#allocation2 + $0x44] ss:$8 sps:$4 sm:$0xff]   ;;  %v1970_v12 = vld [vmem:[#allocation2 + $0x150] ss:$8 sps:$4 sm:$0xff]   ;;  %v1973_v14 = vld [vmem:[#allocation2 + $0x40] ss:$8 sps:$4 sm:$0xff]  }
  0x22   :  { %v1974_v13 = vld [vmem:[#allocation2 + $0x144] ss:$8 sps:$4 sm:$0xff]   ;;  %v1977_v15 = vld [vmem:[#allocation2 + $0x34] ss:$8 sps:$4 sm:$0xff]   ;;  %v1976_v16 = vld [vmem:[#allocation2 + $0x140] ss:$8 sps:$4 sm:$0xff]  }
  0x23   :  { %695 = vmatpush1.bf16.msra.mxu0 %v1961_v5  ;;  %v1980_v17 = vld [vmem:[#allocation2 + $0x134] ss:$8 sps:$4 sm:$0xff]   ;;  %v1979_v18 = vld [vmem:[#allocation2 + $0x30] ss:$8 sps:$4 sm:$0xff]   ;;  %v1983_v19 = vld [vmem:[#allocation2 + $0x24] ss:$8 sps:$4 sm:$0xff]  }
  0x24   :  { %696 = vmatprep.subr.bf16.mxu0 %v1965_v8  ;;  %736 = vmatpush1.bf16.msra.mxu1 %v1964_v7  ;;  %v1982_v20 = vld [vmem:[#allocation2 + $0x130] ss:$8 sps:$4 sm:$0xff]   ;;  %v1986_v21 = vld [vmem:[#allocation2 + $0x124] ss:$8 sps:$4 sm:$0xff]   ;;  %v1985_v22 = vld [vmem:[#allocation2 + $0x20] ss:$8 sps:$4 sm:$0xff]  }
  0x25   :  { %737 = vmatprep.subr.bf16.mxu1 %v1968_v10  ;;  %v1989_v23 = vld [vmem:[#allocation2 + $0x14] ss:$8 sps:$4 sm:$0xff]   ;;  %v1988_v24 = vld [vmem:[#allocation2 + $0x120] ss:$8 sps:$4 sm:$0xff]   ;;  %v1991_v26 = vld [vmem:[#allocation2 + $0x10] ss:$8 sps:$4 sm:$0xff]  }
  0x26   :  { %v1992_v25 = vld [vmem:[#allocation2 + $0x114] ss:$8 sps:$4 sm:$0xff]   ;;  %v1995_v27 = vld [vmem:[#allocation2 + $0x4] ss:$8 sps:$4 sm:$0xff]   ;;  %v1994_v28 = vld [vmem:[#allocation2 + $0x110] ss:$8 sps:$4 sm:$0xff]  }
  0x27   :  { %697 = vmatpush1.bf16.msra.mxu0 %v1967_v9  ;;  %v1998_v29 = vld [vmem:[#allocation2 + $0x104] ss:$8 sps:$4 sm:$0xff]   ;;  %v1997_v30 = vld [vmem:[#allocation2] ss:$8 sps:$4 sm:$0xff]   ;;  %v2001_v31 = vld [vmem:[#allocation2 + $0xf4] ss:$8 sps:$4 sm:$0xff]  }
  0x28   :  { %698 = vmatprep.subr.bf16.mxu0 %v1971_v11  ;;  %738 = vmatpush1.bf16.msra.mxu1 %v1970_v12  ;;  %v2000_v32 = vld [vmem:[#allocation2 + $0x100] ss:$8 sps:$4 sm:$0xff]   ;;  %v2004_v33 = vld [vmem:[#allocation2 + $0x1f4] ss:$8 sps:$4 sm:$0xff]   ;;  %v2003_v34 = vld [vmem:[#allocation2 + $0xf0] ss:$8 sps:$4 sm:$0xff]  }
  0x29   :  { %739 = vmatprep.subr.bf16.mxu1 %v1974_v13  ;;  %v2007_v35 = vld [vmem:[#allocation2 + $0xe4] ss:$8 sps:$4 sm:$0xff]   ;;  %v2006_v36 = vld [vmem:[#allocation2 + $0x1f0] ss:$8 sps:$4 sm:$0xff]   ;;  %v2009_v38 = vld [vmem:[#allocation2 + $0xe0] ss:$8 sps:$4 sm:$0xff]  }
  0x2a   :  { %v2010_v37 = vld [vmem:[#allocation2 + $0x1e4] ss:$8 sps:$4 sm:$0xff]   ;;  %v2013_v39 = vld [vmem:[#allocation2 + $0xd4] ss:$8 sps:$4 sm:$0xff]   ;;  %v2012_v40 = vld [vmem:[#allocation2 + $0x1e0] ss:$8 sps:$4 sm:$0xff]  }
  0x2b   :  { %699 = vmatpush1.bf16.msra.mxu0 %v1973_v14  ;;  %v2016_v41 = vld [vmem:[#allocation2 + $0x1d4] ss:$8 sps:$4 sm:$0xff]   ;;  %v2015_v42 = vld [vmem:[#allocation2 + $0xd0] ss:$8 sps:$4 sm:$0xff]   ;;  %v2019_v43 = vld [vmem:[#allocation2 + $0xc4] ss:$8 sps:$4 sm:$0xff]  }
  0x2c   :  { %700 = vmatprep.subr.bf16.mxu0 %v1977_v15  ;;  %740 = vmatpush1.bf16.msra.mxu1 %v1976_v16  ;;  %v2018_v44 = vld [vmem:[#allocation2 + $0x1d0] ss:$8 sps:$4 sm:$0xff]   ;;  %v2022_v45 = vld [vmem:[#allocation2 + $0x1c4] ss:$8 sps:$4 sm:$0xff]   ;;  %s2551_s3 = sld [smem:[#allocation5_spill]]  ;;  %vm1127_vm0 = vcmask 1041408  }
  0x2d   :  { %741 = vmatprep.subr.bf16.mxu1 %v1980_v17  ;;  %v2021_v47 = vld [vmem:[#allocation2 + $0xc0] ss:$8 sps:$4 sm:$0xff]   ;;  %v2025_v49 = vld [vmem:[#allocation2 + $0xb4] ss:$8 sps:$4 sm:$0xff]   ;;  %v2027_v54 = vld [vmem:[#allocation2 + $0xb0] ss:$8 sps:$4 sm:$0xff]  }
  0x2e   :  { %v2024_v51 = vld [vmem:[#allocation2 + $0x1c0] ss:$8 sps:$4 sm:$0xff]   ;;  %v2028_v53 = vld [vmem:[#allocation2 + $0x1b4] ss:$8 sps:$4 sm:$0xff]   ;;  %v2031_v55 = vld [vmem:[#allocation2 + $0xa4] ss:$8 sps:$4 sm:$0xff]  }
  0x2f   :  { %701 = vmatpush1.bf16.msra.mxu0 %v1979_v18  ;;  %v2030_v56 = vld [vmem:[#allocation2 + $0x1b0] ss:$8 sps:$4 sm:$0xff]   ;;  %v2034_v57 = vld [vmem:[#allocation2 + $0x1a4] ss:$8 sps:$4 sm:$0xff]   ;;  %v2033_v58 = vld [vmem:[#allocation2 + $0xa0] ss:$8 sps:$4 sm:$0xff]  }
  0x30   :  { %702 = vmatprep.subr.bf16.mxu0 %v1983_v19  ;;  %742 = vmatpush1.bf16.msra.mxu1 %v1982_v20  ;;  %v2037_v59 = vld [vmem:[#allocation2 + $0x94] ss:$8 sps:$4 sm:$0xff]   ;;  %v2036_v60 = vld [vmem:[#allocation2 + $0x1a0] ss:$8 sps:$4 sm:$0xff]   ;;  %v2039_v62 = vld [vmem:[#allocation2 + $0x90] ss:$8 sps:$4 sm:$0xff]  }
  0x31   :  { %743 = vmatprep.subr.bf16.mxu1 %v1986_v21  ;;  %v2040_v61 = vld [vmem:[#allocation2 + $0x194] ss:$8 sps:$4 sm:$0xff]   ;;  %v2043_v63 = vld [vmem:[#allocation2 + $0x84] ss:$8 sps:$4 sm:$0xff]   ;;  %v2042_v0 = vld [vmem:[#allocation2 + $0x190] ss:$8 sps:$4 sm:$0xff]  }
  0x32   :  { %v93_v46 = vld [vmem:[%s2551_s3 + $0x8] sm:$0xff]  ;;  %v95_v50 = vld [vmem:[%s2551_s3 + $0x18] sm:$0xff]  ;;  %v92_v4 = vld [vmem:[%s2551_s3] sm:$0xff]  ;;  %s2552_s7 = sld [smem:[#allocation9_spill]]  ;;  %vm2163_vm1 = vmmov 0   ;;  %vm1123_vm2 = vcmask 31744  }
  0x33   :  { %703 = vmatpush1.bf16.msra.mxu0 %v1985_v22  ;;  %v99_v48 = vpack.c.bf16 %v93_v46, %v93_v46  ;;  %v101_v52 = vpack.c.bf16 %v95_v50, %v95_v50  ;;  %v2045_v1 = vld [vmem:[#allocation2 + $0x80] ss:$8 sps:$4 sm:$0xff]   ;;  %v2046_v2 = vld [vmem:[#allocation2 + $0x184] ss:$8 sps:$4 sm:$0xff]   ;;  %v2051_v5 = vld [vmem:[#allocation2 + $0x274] ss:$8 sps:$4 sm:$0xff]   ;;  %v98_v7 = vpack.c.bf16 %v92_v4, %v92_v4 }
  0x34   :  { %704 = vmatprep.subr.bf16.mxu0 %v1989_v23  ;;  %744 = vmatpush1.bf16.msra.mxu1 %v1988_v24  ;;  %v2048_v3 = vld [vmem:[#allocation2 + $0x180] ss:$8 sps:$4 sm:$0xff]   ;;  %v94_v6 = vld [vmem:[%s2551_s3 + $0x10] sm:$0xff]  ;;  %v2054_v10 = vld [vmem:[#allocation2 + $0x264] ss:$8 sps:$4 sm:$0xff]   ;;  %s2553_s1 = sld [smem:[#allocation13_spill]] }
  0x35   :  { %745 = vmatprep.subr.bf16.mxu1 %v1992_v25  ;;  %724 = vmatprep.mubr.bf16.mxu0 %v99_v48  ;;  %v2049_v8 = vld [vmem:[#allocation2 + $0x270] ss:$8 sps:$4 sm:$0xff]   ;;  %v100_v9 = vpack.c.bf16 %v94_v6, %v94_v6  ;;  %v2052_v11 = vld [vmem:[#allocation2 + $0x260] ss:$8 sps:$4 sm:$0xff]   ;;  %v2057_v13 = vld [vmem:[#allocation2 + $0x254] ss:$8 sps:$4 sm:$0xff]  }
  0x36   :  { %765 = vmatprep.mubr.bf16.mxu1 %v101_v52  ;;  %v97_v12 = vld [vmem:[%s2551_s3 + $0x28] sm:$0xff]  ;;  %v2055_v15 = vld [vmem:[#allocation2 + $0x250] ss:$8 sps:$4 sm:$0xff]   ;;  %v2063_v18 = vld [vmem:[#allocation2 + $0x234] ss:$8 sps:$4 sm:$0xff]   ;;  %s2554_s26 = sld [smem:[#allocation6_spill]] }
  0x37   :  { %705 = vmatpush1.bf16.msra.mxu0 %v1991_v26  ;;  %v103_v14 = vpack.c.bf16 %v97_v12, %v97_v12  ;;  %v2060_v16 = vld [vmem:[#allocation2 + $0x244] ss:$8 sps:$4 sm:$0xff]   ;;  %v2058_v17 = vld [vmem:[#allocation2 + $0x240] ss:$8 sps:$4 sm:$0xff]   ;;  %v2061_v19 = vld [vmem:[#allocation2 + $0x230] ss:$8 sps:$4 sm:$0xff]  }
  0x38   :  { %706 = vmatprep.subr.bf16.mxu0 %v1995_v27  ;;  %746 = vmatpush1.bf16.msra.mxu1 %v1994_v28  ;;  %v2066_v20 = vld [vmem:[#allocation2 + $0x224] ss:$8 sps:$4 sm:$0xff]   ;;  %v2064_v21 = vld [vmem:[#allocation2 + $0x220] ss:$8 sps:$4 sm:$0xff]   ;;  %v2069_v22 = vld [vmem:[#allocation2 + $0x214] ss:$8 sps:$4 sm:$0xff]  }
  0x39   :  { %747 = vmatprep.subr.bf16.mxu1 %v1998_v29  ;;  %v2067_v23 = vld [vmem:[#allocation2 + $0x210] ss:$8 sps:$4 sm:$0xff]   ;;  %v2072_v24 = vld [vmem:[#allocation2 + $0x204] ss:$8 sps:$4 sm:$0xff]   ;;  %v2070_v25 = vld [vmem:[#allocation2 + $0x200] ss:$8 sps:$4 sm:$0xff]  }
  0x3a   :  { %v2075_v26 = vld [vmem:[#allocation2 + $0x2f4] ss:$8 sps:$4 sm:$0xff]   ;;  %v2073_v27 = vld [vmem:[#allocation2 + $0x2f0] ss:$8 sps:$4 sm:$0xff]   ;;  %v2078_v28 = vld [vmem:[#allocation2 + $0x2e4] ss:$8 sps:$4 sm:$0xff]  }
  0x3b   :  { %707 = vmatpush1.bf16.msra.mxu0 %v1997_v30  ;;  %v2076_v29 = vld [vmem:[#allocation2 + $0x2e0] ss:$8 sps:$4 sm:$0xff]   ;;  %v2081_v30 = vld [vmem:[#allocation2 + $0x2d4] ss:$8 sps:$4 sm:$0xff]   ;;  %s2555_s28 = sld [smem:[#allocation8_spill]]  ;;  %vm1190_vm7 = vcmask 130048  }
  0x3c   :  { %708 = vmatprep.subr.bf16.mxu0 %v2001_v31  ;;  %748 = vmatpush1.bf16.msra.mxu1 %v2000_v32  ;;  %v2079_v31 = vld [vmem:[#allocation2 + $0x2d0] ss:$8 sps:$4 sm:$0xff]   ;;  %v2084_v32 = vld [vmem:[#allocation2 + $0x2c4] ss:$8 sps:$4 sm:$0xff]   ;;  %s2556_s29 = sld [smem:[#allocation11_spill]]  ;;  %vm1337_vm9 = vcmask 523264  }
  0x3d   :  { %749 = vmatprep.subr.bf16.mxu1 %v2004_v33  ;;  %v2082_v33 = vld [vmem:[#allocation2 + $0x2c0] ss:$8 sps:$4 sm:$0xff]   ;;  %v2099_v46 = vld [vmem:[%s2552_s7 + $0x70] sm:$0xff]   ;;  %v2105_v52 = vld [vmem:[%s2552_s7 + $0x58] sm:$0xff]   ;;  %s2557_s25 = sld [smem:[#allocation10_spill]]  ;;  %vm1405_vm10 = vcmask 261120  }
  0x3e   :  { %v2101_v48 = vld [vmem:[%s2552_s7 + $0x68] sm:$0xff]   ;;  %v2103_v50 = vld [vmem:[%s2552_s7 + $0x60] sm:$0xff]   ;;  %s2558_s4 = sld [smem:[#allocation12_spill]] }
  0x3f   :  { %709 = vmatpush2.bf16.msra.mxu0 %v2003_v34  ;;  %v2087_v34 = vld [vmem:[#allocation2 + $0x2b4] ss:$8 sps:$4 sm:$0xff]  }
  0x40   :  { %710 = vmatprep.subr.bf16.mxu0 %v2007_v35  ;;  %750 = vmatpush2.bf16.msra.mxu1 %v2006_v36  ;;  %v2085_v35 = vld [vmem:[#allocation2 + $0x2b0] ss:$8 sps:$4 sm:$0xff]   ;;  %v2090_v36 = vld [vmem:[#allocation2 + $0x2a4] ss:$8 sps:$4 sm:$0xff]  }
  0x41   :  { %751 = vmatprep.subr.bf16.mxu1 %v2010_v37  ;;  %v2088_v37 = vld [vmem:[#allocation2 + $0x2a0] ss:$8 sps:$4 sm:$0xff]  }
  0x42   :  { %v200_v12 = vld [vmem:[%s2555_s28] sm:$0x3] }
  0x43   :  { %711 = vmatpush2.bf16.msra.mxu0 %v2009_v38  ;;  %v2093_v38 = vld [vmem:[#allocation2 + $0x294] ss:$8 sps:$4 sm:$0xff]  }
  0x44   :  { %712 = vmatprep.subr.bf16.mxu0 %v2013_v39  ;;  %752 = vmatpush2.bf16.msra.mxu1 %v2012_v40  ;;  %v2091_v39 = vld [vmem:[#allocation2 + $0x290] ss:$8 sps:$4 sm:$0xff]   ;;  %v2096_v40 = vld [vmem:[#allocation2 + $0x284] ss:$8 sps:$4 sm:$0xff]  }
  0x45   :  { %753 = vmatprep.subr.bf16.mxu1 %v2016_v41  ;;  %v2094_v41 = vld [vmem:[#allocation2 + $0x280] ss:$8 sps:$4 sm:$0xff]  }
  0x47   :  { %713 = vmatpush2.bf16.msra.mxu0 %v2015_v42  ;;  %v96_v42 = vld [vmem:[%s2551_s3 + $0x20] sm:$0xff] }
  0x48   :  { %714 = vmatprep.subr.bf16.mxu0 %v2019_v43  ;;  %754 = vmatpush2.bf16.msra.mxu1 %v2018_v44  ;;  %v102_v43 = vpack.c.bf16 %v96_v42, %v96_v42  ;;  %v2097_v44 = vld [vmem:[%s2552_s7 + $0x78] sm:$0xff]  }
  0x49   :  { %755 = vmatprep.subr.bf16.mxu1 %v2022_v45  ;;  %v2098_v45 = vld [vmem:[%s2552_s7 + $0x38] sm:$0xff]  }
  0x4b   :  { %715 = vmatpush2.bf16.msra.mxu0 %v2021_v47  ;;  %v2100_v47 = vld [vmem:[%s2552_s7 + $0x30] sm:$0xff]  }
  0x4c   :  { %716 = vmatprep.subr.bf16.mxu0 %v2025_v49  ;;  %756 = vmatpush2.bf16.msra.mxu1 %v2024_v51  ;;  %v2102_v49 = vld [vmem:[%s2552_s7 + $0x28] sm:$0xff]   ;;  %v2104_v51 = vld [vmem:[%s2552_s7 + $0x20] sm:$0xff]  }
  0x4d   :  { %757 = vmatprep.subr.bf16.mxu1 %v2028_v53  ;;  %v2106_v53 = vld [vmem:[%s2552_s7 + $0x18] sm:$0xff]  }
  0x4f   :  { %717 = vmatpush2.bf16.msra.mxu0 %v2027_v54  ;;  %v2107_v54 = vld [vmem:[%s2552_s7 + $0x50] sm:$0xff]  }
  0x50   :  { %718 = vmatprep.subr.bf16.mxu0 %v2031_v55  ;;  %758 = vmatpush2.bf16.msra.mxu1 %v2030_v56  ;;  %v2108_v55 = vld [vmem:[%s2552_s7 + $0x10] sm:$0xff]   ;;  %v2109_v56 = vld [vmem:[%s2552_s7 + $0x48] sm:$0xff]  }
  0x51   :  { %759 = vmatprep.subr.bf16.mxu1 %v2034_v57  ;;  %v2110_v57 = vld [vmem:[%s2552_s7 + $0x8] sm:$0xff]  }
  0x53   :  { %719 = vmatpush2.bf16.msra.mxu0 %v2033_v58  ;;  %v2111_v58 = vld [vmem:[%s2552_s7 + $0x40] sm:$0xff]  }
  0x54   :  { %720 = vmatprep.subr.bf16.mxu0 %v2037_v59  ;;  %760 = vmatpush2.bf16.msra.mxu1 %v2036_v60  ;;  %v2112_v59 = vld [vmem:[%s2552_s7] sm:$0xff]  }
  0x55   :  { %761 = vmatprep.subr.bf16.mxu1 %v2040_v61  ;;  %v1115_v60 = vld [vmem:[%s2553_s1] sm:$0x3] }
  0x56   :  { %v1113_v61 = vld [vmem:[%s2554_s26] sm:$0xff] }
  0x57   :  { %721 = vmatpush2.bf16.msra.mxu0 %v2039_v62  ;;  %v2162_v62 = vmov 0.0  }
  0x58   :  { %722 = vmatprep.subr.bf16.mxu0 %v2043_v63  ;;  %762 = vmatpush2.bf16.msra.mxu1 %v2042_v0  ;;  %v1129_v63 = vsel %vm1127_vm0, %v1115_v60, 0  ;;  %v1114_v0 = vpack.c.bf16 %v1113_v61, %v1113_v61  ;;  %v2122_v60 = vld [vmem:[%s2525_s12] sm:$0xff]   ;;  %v2123_v61 = vld [vmem:[%s2527_s14 + $0x18] sm:$0xff]  }
  0x59   :  { %763 = vmatprep.subr.bf16.mxu1 %v2046_v2 }
  0x5b   :  { %723 = vmatpush2.bf16.msra.mxu0 %v2045_v1 }
  0x5c   :  { %774 = vmatprep.subr.bf16.mxu0 %v2051_v5  ;;  %764 = vmatpush2.bf16.msra.mxu1 %v2048_v3 }
  0x5d   :  { %1812 = vmatprep.subr.bf16.mxu1 %v2097_v44 }
  0x5e   :  { %725 = vmatmul.mubr.bf16.vlgmr.msra.gmra.mxu0 %v98_v7 }
  0x5f   :  { %775 = vmatpush1.bf16.msra.mxu0 %v2049_v8  ;;  %766 = vmatmul.mubr.bf16.vlgmr.msra.gmra.mxu1 %v100_v9  ;;  %v202_v9 = vlaneseq }
  0x60   :  { %776 = vmatprep.subr.bf16.mxu0 %v2054_v10  ;;  %806 = vmatprep.mubr.bf16.mxu0 %v103_v14 }
  0x61   :  { %1813 = vmatpush3.bf16.msra.mxu1 %v2098_v45  ;;  %v203_v10 = vshrl.u32 %v202_v9, 7  ;;  %v1756_v45 = vld [vmem:[%s2557_s25] ss:$0 sm:$0xff] }
  0x62   :  { %1814 = vmatprep.subr.bf16.mxu1 %v2099_v46 }
  0x63   :  { %777 = vmatpush1.bf16.msra.mxu0 %v2052_v11  ;;  %v204_v11 = vsub.s32 0, %v203_v10 }
  0x64   :  { %778 = vmatprep.subr.bf16.mxu0 %v2057_v13  ;;  %v208_v13 = vsub.s32 1, %v203_v10 }
  0x65   :  { %1815 = vmatpush3.bf16.msra.mxu1 %v2100_v47  ;;  %v205_v14 = vrot.slane %v200_v12, %v204_v11 }
  0x66   :  { %1816 = vmatprep.subr.bf16.mxu1 %v2101_v48 }
  0x67   :  { %779 = vmatpush1.bf16.msra.mxu0 %v2055_v15  ;;  %v209_v15 = vrot.slane %v200_v12, %v208_v13  ;;  %v2125_v13 = vld [vmem:[%s2527_s14 + $0x8] sm:$0xff]  }
  0x68   :  { %780 = vmatprep.subr.bf16.mxu0 %v2060_v16 }
  0x69   :  { %1817 = vmatpush3.bf16.msra.mxu1 %v2102_v49  ;;  %v1782_v49 = vld [vmem:[%s2522_s9] ss:$0 sm:$0xff] }
  0x6a   :  { %1818 = vmatprep.subr.bf16.mxu1 %v2103_v50 }
  0x6b   :  { %781 = vmatpush1.bf16.msra.mxu0 %v2058_v17 }
  0x6c   :  { %782 = vmatprep.subr.bf16.mxu0 %v2063_v18 }
  0x6d   :  { %1819 = vmatpush3.bf16.msra.mxu1 %v2104_v51 }
  0x6e   :  { %1820 = vmatprep.subr.bf16.mxu1 %v2105_v52 }
  0x6f   :  { %783 = vmatpush1.bf16.msra.mxu0 %v2061_v19 }
  0x70   :  { %784 = vmatprep.subr.bf16.mxu0 %v2066_v20 }
  0x71   :  { %1821 = vmatpush3.bf16.msra.mxu1 %v2106_v53 }
  0x72   :  { %1822 = vmatprep.subr.bf16.mxu1 %v2107_v54 }
  0x73   :  { %785 = vmatpush1.bf16.msra.mxu0 %v2064_v21 }
  0x74   :  { %786 = vmatprep.subr.bf16.mxu0 %v2069_v22 }
  0x75   :  { %1823 = vmatpush3.bf16.msra.mxu1 %v2108_v55  ;;  %v2121_v55 = vld [vmem:[%s2523_s10] sm:$0xff]  }
  0x76   :  { %1824 = vmatprep.subr.bf16.mxu1 %v2109_v56 }
  0x77   :  { %787 = vmatpush1.bf16.msra.mxu0 %v2067_v23 }
  0x78   :  { %788 = vmatprep.subr.bf16.mxu0 %v2072_v24 }
  0x79   :  { %1825 = vmatpush3.bf16.msra.mxu1 %v2110_v57 }
  0x7a   :  { %1826 = vmatprep.subr.bf16.mxu1 %v2111_v58 }
  0x7b   :  { %789 = vmatpush1.bf16.msra.mxu0 %v2070_v25 }
  0x7c   :  { %790 = vmatprep.subr.bf16.mxu0 %v2075_v26 }
  0x7d   :  { %1827 = vmatpush3.bf16.msra.mxu1 %v2112_v59 }
  0x7e   :  { %1866 = vmatprep.subr.bf16.mxu1 %v2162_v62 }
  0x7f   :  { %791 = vmatpush2.bf16.msra.mxu0 %v2073_v27 }
  0x80   :  { %792 = vmatprep.subr.bf16.mxu0 %v2078_v28 }
  0x83   :  { %793 = vmatpush2.bf16.msra.mxu0 %v2076_v29 }
  0x84   :  { %794 = vmatprep.subr.bf16.mxu0 %v2081_v30 }
  0x87   :  { %795 = vmatpush2.bf16.msra.mxu0 %v2079_v31  ;;  %v2113_v31 = vld [vmem:[%s2556_s29 + $0x38] sm:$0xff]  }
  0x88   :  { %796 = vmatprep.subr.bf16.mxu0 %v2084_v32 }
  0x8b   :  { %797 = vmatpush2.bf16.msra.mxu0 %v2082_v33  ;;  %v2114_v33 = vld [vmem:[%s2556_s29 + $0x30] sm:$0xff]  }
  0x8c   :  { %798 = vmatprep.subr.bf16.mxu0 %v2087_v34  ;;  %v2115_v34 = vld [vmem:[%s2556_s29 + $0x28] sm:$0xff]  }
  0x8f   :  { %799 = vmatpush2.bf16.msra.mxu0 %v2085_v35  ;;  %v2116_v35 = vld [vmem:[%s2556_s29 + $0x20] sm:$0xff]  }
  0x90   :  { %800 = vmatprep.subr.bf16.mxu0 %v2090_v36  ;;  %v2117_v36 = vld [vmem:[%s2556_s29 + $0x18] sm:$0xff]  }
  0x93   :  { %801 = vmatpush2.bf16.msra.mxu0 %v2088_v37  ;;  %v2118_v37 = vld [vmem:[%s2556_s29 + $0x10] sm:$0xff]  }
  0x94   :  { %802 = vmatprep.subr.bf16.mxu0 %v2093_v38  ;;  %v2119_v38 = vld [vmem:[%s2556_s29 + $0x8] sm:$0xff]  }
  0x97   :  { %803 = vmatpush2.bf16.msra.mxu0 %v2091_v39 }
  0x98   :  { %804 = vmatprep.subr.bf16.mxu0 %v2096_v40  ;;  %v2120_v40 = vld [vmem:[%s2556_s29] sm:$0xff]  }
  0x9b   :  { %805 = vmatpush2.bf16.msra.mxu0 %v2094_v41 }
  0x9c   :  { %1886 = vmatprep.subr.bf16.mxu0 %v2162_v62 }
  0x9e   :  { %807 = vmatmul.mubr.bf16.vlgmr.msra.gmra.mxu0 %v102_v43 }
  0x9f   :  { %1888 = vmatprep.mubr.msk.bf16.mxu0 %vm2163_vm1, %v2162_v62  ;;  %1887 = vmatpush3.bf16.msra.mxu0 %v1129_v63  ;;  %v2124_v63 = vld [vmem:[%s2527_s14 + $0x10] sm:$0xff]  }
  0xa0   :  { %1898 = vmatprep.subr.bf16.mxu0 %v2162_v62 }
  0xa6   :  { %1889 = vmatmul.mubr.msk.bf16.vlgmr.msra.gmra.mxu0 %vm1123_vm2, %v1114_v0 }
  0xa7   :  { %1900 = vmatprep.mubr.msk.bf16.mxu0 %vm2163_vm1, %v2162_v62  ;;  %1899 = vmatpush3.bf16.msra.mxu0 %v2122_v60 }
  0xa8   :  { %1916 = vmatprep.subr.bf16.mxu0 %v2162_v62 }
 0x11e   :  { %v726_v1 = vpop.f32.mrf.mxu0 }
 0x11f   :  { %v767_v3 = vpop.f32.mrf.mxu1  ;;  %v727_v16 = vadd.f32 %v726_v1, %v205_v14  ;;  %v2126_v14 = vld [vmem:[%s2527_s14] sm:$0xff]  }
 0x120   :  { %v728_v2 = vpop.f32.mrf.mxu0 }
 0x121   :  { %v769_v5 = vpop.f32.mrf.mxu1  ;;  %v729_v17 = vadd.f32 %v728_v2, %v209_v15  ;;  %v768_v18 = vadd.f32 %v767_v3, %v727_v16  ;;  %v2127_v15 = vld [vmem:[%s2529_s16 + $0x8] sm:$0xff]   ;;  %v1773_v16 = vld [vmem:[%s2558_s4] ss:$0 sm:$0xff] }
 0x122   :  { %v730_v4 = vpop.f32.mrf.mxu0 }
 0x123   :  { %v771_v7 = vpop.f32.mrf.mxu1  ;;  %v770_v20 = vadd.f32 %v769_v5, %v729_v17  ;;  %v1784_v4 = vld [vmem:[%s2524_s11] ss:$0 sm:$0xff] }
 0x124   :  { %v731_v6 = vpop.f32.mrf.mxu0  ;;  %v1787_v17 = vld [vmem:[%s2526_s13] ss:$0 sm:$0xff] }
 0x125   :  { %v772_v8 = vpop.f32.mrf.mxu1 }
 0x15e   :  { %v808_v19 = vpop.f32.mrf.mxu0 }
 0x15f   :  { %v809_v21 = vadd.f32 %v808_v19, %v768_v18 }
 0x160   :  { %v810_v22 = vpop.f32.mrf.mxu0 }
 0x161   :  { %vm815_vm3 = vcmp.gt.f32.partialorder %v809_v21, 0.0  ;;  %v817_v23 = vmul.f32 0.2, %v809_v21  ;;  %v811_v24 = vadd.f32 %v810_v22, %v770_v20 }
 0x162   :  { %v812_v25 = vpop.f32.mrf.mxu0 }
 0x163   :  { %vm816_vm4 = vcmp.gt.f32.partialorder %v811_v24, 0.0  ;;  %v818_v26 = vmul.f32 0.2, %v811_v24  ;;  %v819_v27 = vsel %vm815_vm3, %v809_v21, %v817_v23 }
 0x164   :  { %v813_v28 = vpop.f32.mrf.mxu0  ;;  %v821_v32 = vpack.c.bf16 %v819_v27, %v819_v27  ;;  %v1790_v27 = vld [vmem:[%s2528_s15] ss:$0 sm:$0xff] }
 0x165   :  { %v820_v29 = vsel %vm816_vm4, %v811_v24, %v818_v26  ;;  %v2128_v26 = vld [vmem:[%s2529_s16] sm:$0xff]  }
 0x166   :  { %v822_v30 = vpack.c.bf16 %v820_v29, %v820_v29  ;;  %v1165_v39 = vpop.f32.mrf.mxu0 }
 0x167   :  { %v1166_v53 = vadd.f32 %v1782_v49, %v1165_v39 }
 0x168   :  { %990 = vmatprep.mubr.bf16.mxu1 %v822_v30  ;;  %v1890_v41 = vpop.f32.mrf.mxu0 }
 0x169   :  { %991 = vmatmul.mubr.bf16.vlgmr.msra.gmra.mxu1 %v821_v32  ;;  %v1172_v57 = vmul.f32 0.2, %v1166_v53  ;;  %vm1171_vm6 = vcmp.gt.f32.partialorder %v1166_v53, 0.0 }
 0x16a   :  { %1867 = vmatpush3.bf16.msra.mxu1 %v2113_v31  ;;  %1882 = vmatprep.mubr.msk.bf16.mxu1 %vm2163_vm1, %v2162_v62  ;;  %v1168_v42 = vpop.f32.mrf.mxu0  ;;  %v2129_v31 = vld [vmem:[%s2531_s18 + $0x8] sm:$0xff]  }
 0x16b   :  { %1868 = vmatprep.subr.bf16.mxu1 %v2162_v62  ;;  %v1173_v58 = vsel %vm1171_vm6, %v1166_v53, %v1172_v57 }
 0x16c   :  { %v1891_v43 = vpop.f32.mrf.mxu0  ;;  %v1174_v59 = vpack.c.bf16 %v1173_v58, %v1173_v58 }
 0x16e   :  { %1869 = vmatpush3.bf16.msra.mxu1 %v2114_v33 }
 0x16f   :  { %1870 = vmatprep.subr.bf16.mxu1 %v2162_v62 }
 0x172   :  { %1871 = vmatpush3.bf16.msra.mxu1 %v2115_v34 }
 0x173   :  { %1872 = vmatprep.subr.bf16.mxu1 %v2162_v62 }
 0x176   :  { %1873 = vmatpush3.bf16.msra.mxu1 %v2116_v35  ;;  %v2130_v35 = vld [vmem:[%s2531_s18] sm:$0xff]  }
 0x177   :  { %1874 = vmatprep.subr.bf16.mxu1 %v2162_v62 }
 0x17a   :  { %1875 = vmatpush3.bf16.msra.mxu1 %v2117_v36  ;;  %v2131_v36 = vld [vmem:[%s2533_s20 + $0x8] sm:$0xff]  }
 0x17b   :  { %1876 = vmatprep.subr.bf16.mxu1 %v2162_v62 }
 0x17e   :  { %1877 = vmatpush3.bf16.msra.mxu1 %v2118_v37  ;;  %v1796_v37 = vld [vmem:[%s2530_s17] ss:$0 sm:$0xff] }
 0x17f   :  { %1878 = vmatprep.subr.bf16.mxu1 %v2162_v62 }
 0x182   :  { %1879 = vmatpush3.bf16.msra.mxu1 %v2119_v38 }
 0x183   :  { %1880 = vmatprep.subr.bf16.mxu1 %v2162_v62 }
 0x186   :  { %1881 = vmatpush3.bf16.msra.mxu1 %v2120_v40 }
 0x187   :  { %1892 = vmatprep.subr.bf16.mxu1 %v2162_v62 }
 0x229   :  { %v1828_v44 = vpop.f32.mrf.mxu1 }
 0x22b   :  { %v1829_v46 = vpop.f32.mrf.mxu1 }
 0x22c   :  { %v1830_v47 = vadd.f32 %v1829_v46, %v1828_v44  ;;  %v2133_v46 = vld [vmem:[%s2535_s22 + $0x8] sm:$0xff]  }
 0x22d   :  { %v1831_v48 = vpop.f32.mrf.mxu1 }
 0x22e   :  { %v993_v50 = vadd.f32 %v1830_v47, %v1756_v45  ;;  %v2132_v45 = vld [vmem:[%s2533_s20] sm:$0xff]  }
 0x22f   :  { %v1832_v51 = vpop.f32.mrf.mxu1  ;;  %v1800_v47 = vld [vmem:[%s2532_s19] ss:$0 sm:$0xff] }
 0x230   :  { %vm998_vm5 = vcmp.gt.f32.partialorder %v993_v50, 0.0  ;;  %v999_v52 = vmul.f32 0.2, %v993_v50 }
 0x232   :  { %v1000_v54 = vsel %vm998_vm5, %v993_v50, %v999_v52 }
 0x233   :  { %v1001_v56 = vpack.c.bf16 %v1000_v54, %v1000_v54 }
 0x235   :  { %1883 = vmatmul.mubr.bf16.vlgmr.msra.gmra.mxu1 %v1001_v56 }
 0x236   :  { %1893 = vmatpush3.bf16.msra.mxu1 %v2121_v55  ;;  %1894 = vmatprep.mubr.msk.bf16.mxu1 %vm2163_vm1, %v2162_v62  ;;  %v2134_v55 = vld [vmem:[%s2535_s22] sm:$0xff]  }
 0x237   :  { %1904 = vmatprep.subr.bf16.mxu1 %v2162_v62 }
 0x23d   :  { %1895 = vmatmul.mubr.msk.bf16.vlgmr.msra.gmra.mxu1 %vm1190_vm7, %v1174_v59 }
 0x23e   :  { %1912 = vmatprep.mubr.msk.bf16.mxu1 %vm2163_vm1, %v2162_v62  ;;  %1905 = vmatpush3.bf16.msra.mxu1 %v2123_v61 }
 0x23f   :  { %1906 = vmatprep.subr.bf16.mxu1 %v2162_v62 }
 0x242   :  { %1907 = vmatpush3.bf16.msra.mxu1 %v2124_v63 }
 0x243   :  { %1908 = vmatprep.subr.bf16.mxu1 %v2162_v62 }
 0x246   :  { %1909 = vmatpush3.bf16.msra.mxu1 %v2125_v13 }
 0x247   :  { %1910 = vmatprep.subr.bf16.mxu1 %v2162_v62 }
 0x24a   :  { %1911 = vmatpush3.bf16.msra.mxu1 %v2126_v14 }
 0x24b   :  { %1932 = vmatprep.subr.bf16.mxu1 %v2162_v62 }
 0x2f5   :  { %v1107_v0 = vpop.f32.mrf.mxu1 }
 0x2f6   :  { %v1108_v19 = vadd.f32 %v1773_v16, %v1107_v0  ;;  %v1808_v0 = vld [vmem:[%s2536_s23] ss:$0 sm:$0xff] }
 0x2f7   :  { %v1884_v1 = vpop.f32.mrf.mxu1 }
 0x2f9   :  { %v1110_v2 = vpop.f32.mrf.mxu1 }
 0x2fb   :  { %v1885_v3 = vpop.f32.mrf.mxu1 }
 0x2fd   :  { %v1228_v5 = vpop.f32.mrf.mxu1 }
 0x2fe   :  { %v1229_v6 = vadd.f32 %v1784_v4, %v1228_v5 }
 0x2ff   :  { %v1896_v7 = vpop.f32.mrf.mxu1 }
 0x300   :  { %vm1234_vm8 = vcmp.gt.f32.partialorder %v1229_v6, 0.0  ;;  %v1235_v8 = vmul.f32 0.2, %v1229_v6 }
 0x301   :  { %v1231_v9 = vpop.f32.mrf.mxu1 }
 0x302   :  { %v1236_v10 = vsel %vm1234_vm8, %v1229_v6, %v1235_v8 }
 0x303   :  { %v1237_v11 = vpack.c.bf16 %v1236_v10, %v1236_v10  ;;  %v1897_v12 = vpop.f32.mrf.mxu1 }
 0x305   :  { %1901 = vmatmul.mubr.msk.bf16.vlgmr.msra.gmra.mxu0 %vm1190_vm7, %v1237_v11 }
 0x306   :  { %1920 = vmatprep.mubr.msk.bf16.mxu0 %vm2163_vm1, %v2162_v62  ;;  %1917 = vmatpush3.bf16.msra.mxu0 %v2127_v15 }
 0x307   :  { %1918 = vmatprep.subr.bf16.mxu0 %v2162_v62 }
 0x30a   :  { %1919 = vmatpush3.bf16.msra.mxu0 %v2128_v26 }
 0x30b   :  { %1924 = vmatprep.subr.bf16.mxu0 %v2162_v62 }
 0x3c5   :  { %v1290_v18 = vpop.f32.mrf.mxu0 }
 0x3c6   :  { %v1291_v20 = vadd.f32 %v1787_v17, %v1290_v18 }
 0x3c7   :  { %v1902_v21 = vpop.f32.mrf.mxu0 }
 0x3c8   :  { %v1296_v22 = vadd.f32 %v1291_v20, %v1108_v19 }
 0x3c9   :  { %v1293_v23 = vpop.f32.mrf.mxu0 }
 0x3ca   :  { %v1297_v24 = vpack.c.bf16 %v1296_v22, %v1296_v22 }
 0x3cb   :  { %v1903_v25 = vpop.f32.mrf.mxu0 }
 0x3cc   :  { %1913 = vmatmul.mubr.msk.bf16.vlgmr.msra.gmra.mxu1 %vm1337_vm9, %v1297_v24 }
 0x3cd   :  { %1936 = vmatprep.mubr.msk.bf16.mxu1 %vm2163_vm1, %v2162_v62  ;;  %1933 = vmatpush3.bf16.msra.mxu1 %v2131_v36 }
 0x3ce   :  { %1934 = vmatprep.subr.bf16.mxu1 %v2162_v62 }
 0x3d1   :  { %1935 = vmatpush3.bf16.msra.mxu1 %v2132_v45 }
 0x48c   :  { %v1375_v28 = vpop.f32.mrf.mxu1 }
 0x48d   :  { %v1376_v29 = vadd.f32 %v1790_v27, %v1375_v28 }
 0x48e   :  { %v1914_v30 = vpop.f32.mrf.mxu1 }
 0x48f   :  { %v1381_v32 = vpack.c.bf16 %v1376_v29, %v1376_v29 }
 0x490   :  { %v1378_v33 = vpop.f32.mrf.mxu1 }
 0x491   :  { %1921 = vmatmul.mubr.msk.bf16.vlgmr.msra.gmra.mxu0 %vm1405_vm10, %v1381_v32 }
 0x492   :  { %v1915_v34 = vpop.f32.mrf.mxu1  ;;  %1925 = vmatpush3.bf16.msra.mxu0 %v2129_v31  ;;  %1928 = vmatprep.mubr.msk.bf16.mxu0 %vm2163_vm1, %v2162_v62 }
 0x493   :  { %1926 = vmatprep.subr.bf16.mxu0 %v2162_v62 }
 0x496   :  { %1927 = vmatpush3.bf16.msra.mxu0 %v2130_v35 }
 0x497   :  { %1940 = vmatprep.subr.bf16.mxu0 %v2162_v62 }
 0x551   :  { %v1443_v38 = vpop.f32.mrf.mxu0 }
 0x552   :  { %v1444_v39 = vadd.f32 %v1796_v37, %v1443_v38 }
 0x553   :  { %v1922_v40 = vpop.f32.mrf.mxu0 }
 0x554   :  { %v1449_v41 = vmax.f32 %v1444_v39, 0.0 }
 0x555   :  { %v1446_v42 = vpop.f32.mrf.mxu0 }
 0x556   :  { %v1450_v43 = vpack.c.bf16 %v1449_v41, %v1449_v41 }
 0x557   :  { %v1923_v44 = vpop.f32.mrf.mxu0 }
 0x558   :  { %1929 = vmatmul.mubr.msk.bf16.vlgmr.msra.gmra.mxu0 %vm1405_vm10, %v1450_v43 }
 0x559   :  { %1944 = vmatprep.mubr.msk.bf16.mxu0 %vm2163_vm1, %v2162_v62  ;;  %1941 = vmatpush3.bf16.msra.mxu0 %v2133_v46 }
 0x55a   :  { %1942 = vmatprep.subr.bf16.mxu0 %v2162_v62  ;;  %v1804_v62 = vld [vmem:[%s2534_s21] ss:$0 sm:$0xff] }
 0x55d   :  { %1943 = vmatpush3.bf16.msra.mxu0 %v2134_v55 }
 0x618   :  { %v1511_v48 = vpop.f32.mrf.mxu0 }
 0x619   :  { %v1512_v49 = vadd.f32 %v1800_v47, %v1511_v48 }
 0x61a   :  { %v1930_v50 = vpop.f32.mrf.mxu0 }
 0x61b   :  { %v1517_v51 = vmax.f32 %v1512_v49, 0.0 }
 0x61c   :  { %v1514_v52 = vpop.f32.mrf.mxu0 }
 0x61d   :  { %v1518_v53 = vpack.c.bf16 %v1517_v51, %v1517_v51 }
 0x61e   :  { %v1931_v54 = vpop.f32.mrf.mxu0 }
 0x61f   :  { %1937 = vmatmul.mubr.msk.bf16.vlgmr.msra.gmra.mxu1 %vm1405_vm10, %v1518_v53 }
 0x6df   :  { %v1579_v56 = vpop.f32.mrf.mxu1 }
 0x6e0   :  { %v1580_v57 = vadd.f32 %v1804_v62, %v1579_v56 }
 0x6e1   :  { %v1938_v58 = vpop.f32.mrf.mxu1 }
 0x6e2   :  { %v1585_v59 = vmax.f32 %v1580_v57, 0.0 }
 0x6e3   :  { %v1582_v60 = vpop.f32.mrf.mxu1 }
 0x6e4   :  { %v1586_v61 = vpack.c.bf16 %v1585_v59, %v1585_v59 }
 0x6e5   :  { %v1939_v63 = vpop.f32.mrf.mxu1 }
 0x6e6   :  { %1945 = vmatmul.mubr.msk.bf16.vlgmr.msra.gmra.mxu0 %vm1405_vm10, %v1586_v61 }
 0x7a6   :  { %v1647_v1 = vpop.f32.mrf.mxu0 }
 0x7a7   :  { %v1648_v2 = vadd.f32 %v1808_v0, %v1647_v1 }
 0x7a8   :  { %v1946_v3 = vpop.f32.mrf.mxu0 }
 0x7a9   :  { %2135 = vtanh.f32 %v1648_v2 }
 0x7aa   :  { %v1650_v4 = vpop.f32.mrf.mxu0 }
 0x7ac   :  { %v1947_v5 = vpop.f32.mrf.mxu0 }
 0x7b6   :  { %v2136_v6 = vpop.eup %2135 }
 0x7b7   :  { %1654 = vst [vmem:[%s2537_s24] sm:$0xff] %v2136_v6 }
 0x7b8   :  { %1659 = vsyncpa [#allocation3], 1 }

</bundles_post_ra>
